<compile_context>
chip_gen: v5e
topology: v5e:2x2
jax: 0.10.0
libtpu: 0.0.40
codegen_flags: <defaults>
</compile_context>

<pallas_src>
import functools

import jax
import jax.numpy as jnp
from jax.experimental import pallas as pl
from jax.experimental.pallas import tpu as pltpu

NEG_SLOPE = 0.01  # F.leaky_relu default negative_slope


def _round_up(v, m):
    return (v + m - 1) // m * m


# ----------------------------------------------------------------------------
# Packed-parameter slab layout: every segment starts on an 8-row boundary so
# in-kernel static slices stay sublane-tile aligned. Columns zero-padded to the
# widest fan-out.
# ----------------------------------------------------------------------------
def make_param_layout(nbr_nodes, in_c, hid_c, out_c):
    layout = {}
    off = 0

    def seg(name, rows):
        nonlocal off
        layout[name] = (off, rows)
        off = _round_up(off + rows, 8)

    seg("imp", nbr_nodes)
    seg("w1", in_c)
    seg("b1", 1)
    seg("w2", hid_c)
    seg("b2", 1)
    seg("w3", hid_c)
    seg("b3", 1)
    layout["_rows"] = off
    layout["_width"] = max(in_c, hid_c, out_c)
    return layout


# ----------------------------------------------------------------------------
# Fused kernel: gather + NaN-fill + linear1/2/3 + leaky_relu, all in VMEM,
# 3 input DMAs / 1 output DMA.
# ----------------------------------------------------------------------------
def _fused_teacher_features_kernel(layout, hid_c, out_c,
                                   x_ref, idx_ref, p_ref, out_ref):
    n_rows, in_c = x_ref.shape
    nbr_nodes = layout["imp"][1]

    def param(name, cols):
        r0, rows = layout[name]
        return p_ref[r0:r0 + rows, :cols]          # static slice of resident slab

    # --- imp_features[idx] as a one-hot matmul (MXU-friendly row gather) ---
    col_iota = jax.lax.broadcasted_iota(jnp.int32, (n_rows, nbr_nodes), 1)
    onehot = (idx_ref[...] == col_iota).astype(jnp.float32)          # (N, nbr_nodes)
    imp_red = jnp.dot(onehot, param("imp", in_c),
                      preferred_element_type=jnp.float32)            # (N, in_c)

    # --- NaN fill: x[nan_mask] = imp_feat_reduced[nan_mask] ---
    x = x_ref[...]
    h = jnp.where(jnp.isnan(x), imp_red, x)

    def leaky(v):
        return jnp.maximum(v, NEG_SLOPE * v)       # single vmax, no cmp+select

    # --- linear1 ---
    m1 = jnp.dot(h, param("w1", hid_c),
                 preferred_element_type=jnp.float32) + param("b1", hid_c)
    out_ref[:, 0:hid_c] = m1
    h = leaky(m1)                                  # dropout = identity (eval)

    # --- linear2 ---
    m2 = jnp.dot(h, param("w2", hid_c),
                 preferred_element_type=jnp.float32) + param("b2", hid_c)
    out_ref[:, hid_c:2 * hid_c] = m2
    h = leaky(m2)

    # --- linear3 ---
    m3 = jnp.dot(h, param("w3", out_c),
                 preferred_element_type=jnp.float32) + param("b3", out_c)
    out_ref[:, 2 * hid_c:2 * hid_c + out_c] = m3
    out_ref[:, 2 * hid_c + out_c:2 * hid_c + 2 * out_c] = leaky(m3)


# ----------------------------------------------------------------------------
# Wrapper
# ----------------------------------------------------------------------------
def teacher_features_forward(params, x, pe_idx):
    """Mirrors TeacherFeatures.forward (eval mode).

    x      : (N, in_c)  float32, may contain NaN
    pe_idx : (N, 1)     int32   — pe_feat._indices()[1] (one node id per row of x),
                                  pre-shaped by the caller (no per-call convert/reshape)
    returns: (final_act (N, out_c), [mid1 (N, hid), mid2 (N, hid), mid3 (N, out_c)])
    """
    N, _ = x.shape
    _, _, hid_c, out_c = params["dims"]
    layout = params["layout"]
    assert pe_idx.shape == (N, 1) and pe_idx.dtype == jnp.int32

    kernel = functools.partial(_fused_teacher_features_kernel, layout, hid_c, out_c)
    vmem = pl.BlockSpec(memory_space=pltpu.MemorySpace.VMEM)
    packed_width = 2 * hid_c + 2 * out_c

    packed = pl.pallas_call(
        kernel,
        out_shape=jax.ShapeDtypeStruct((N, packed_width), jnp.float32),
        in_specs=[vmem, vmem, vmem],
        out_specs=vmem,
    )(x, pe_idx, params["slab"])

    m1 = packed[:, 0:hid_c]
    m2 = packed[:, hid_c:2 * hid_c]
    m3 = packed[:, 2 * hid_c:2 * hid_c + out_c]
    y = packed[:, 2 * hid_c + out_c:packed_width]
    return y, [m1, m2, m3]


# ----------------------------------------------------------------------------
# Parameter init (PyTorch-style), with weights pre-transposed and packed once
# into a single slab.
# ----------------------------------------------------------------------------
def init_params(key, nbr_nodes, in_c, hid_c, out_c):
    k_imp, k1, k2, k3 = jax.random.split(key, 4)

    # imp_features: xavier_uniform_(gain=1.414)
    a = 1.414 * (6.0 / (nbr_nodes + in_c)) ** 0.5
    imp = jax.random.uniform(k_imp, (nbr_nodes, in_c), jnp.float32, -a, a)

    def kaiming_t(k, fan_in, fan_out):
        # kaiming_uniform_(mode='fan_in', nonlinearity='leaky_relu') -> gain = sqrt(2)
        bound = (2.0 ** 0.5) * (3.0 / fan_in) ** 0.5
        # stored pre-transposed: (fan_in, fan_out), so the kernel does x @ W directly
        return jax.random.uniform(k, (fan_in, fan_out), jnp.float32, -bound, bound)

    w1 = kaiming_t(k1, in_c, hid_c)
    w2 = kaiming_t(k2, hid_c, hid_c)
    w3 = kaiming_t(k3, hid_c, out_c)
    b1 = jnp.zeros((1, hid_c), jnp.float32)
    b2 = jnp.zeros((1, hid_c), jnp.float32)
    b3 = jnp.zeros((1, out_c), jnp.float32)

    layout = make_param_layout(nbr_nodes, in_c, hid_c, out_c)
    slab = jnp.zeros((layout["_rows"], layout["_width"]), jnp.float32)

    def put(s, name, val):
        r0, rows = layout[name]
        return s.at[r0:r0 + rows, :val.shape[1]].set(val)

    for name, val in (("imp", imp), ("w1", w1), ("b1", b1),
                      ("w2", w2), ("b2", b2), ("w3", w3), ("b3", b3)):
        slab = put(slab, name, val)

    return {
        "slab": slab, "layout": layout, "dims": (nbr_nodes, in_c, hid_c, out_c),
        # unpacked copies kept only for the pure-JAX reference check
        "imp_features": imp, "w1": w1, "b1": b1, "w2": w2, "b2": b2, "w3": w3, "b3": b3,
    }


# ----------------------------------------------------------------------------
if __name__ == "__main__":
    key = jax.random.PRNGKey(0)
    nbr_nodes = 16        # config['nbr_nodes']
    N = 16                # rows of x (== number of PE column indices)
    in_c = 8              # in_channels_feat
    hid_c = 32            # hid_channels_feat
    out_c = 8             # out_channels_feat

    kp, kx, km, ki = jax.random.split(key, 4)
    params = init_params(kp, nbr_nodes, in_c, hid_c, out_c)

    x = jax.random.normal(kx, (N, in_c), jnp.float32)
    nan_mask = jax.random.uniform(km, (N, in_c)) < 0.2
    x = jnp.where(nan_mask, jnp.nan, x)
    # pe_feat._indices()[1]: one node id per row; pre-shaped (N, 1) int32 once here.
    pe_idx = jax.random.permutation(ki, jnp.arange(nbr_nodes, dtype=jnp.int32)).reshape(N, 1)

    y, middle = teacher_features_forward(params, x, pe_idx)
    y = jax.block_until_ready(y)
    middle = jax.block_until_ready(middle)

    # Pure-JAX reference for correctness
    def ref_forward(p, xr, idx):
        h = jnp.where(jnp.isnan(xr), p["imp_features"][idx], xr)
        mids = []
        for wn, bn in (("w1", "b1"), ("w2", "b2"), ("w3", "b3")):
            h = h @ p[wn] + p[bn]
            mids.append(h)
            h = jnp.where(h > 0, h, NEG_SLOPE * h)
        return h, mids

    y_ref, mids_ref = ref_forward(params, x, pe_idx[:, 0])

    assert y.shape == (N, out_c)
    assert [m.shape for m in middle] == [(N, hid_c), (N, hid_c), (N, out_c)]
    assert not bool(jnp.any(jnp.isnan(y)))
    assert bool(jnp.allclose(y, y_ref, atol=1e-5, rtol=1e-5))
    for m, mr in zip(middle, mids_ref):
        assert bool(jnp.allclose(m, mr, atol=1e-5, rtol=1e-5))

    print("KERNEL_OK")
</pallas_src>

<mosaic_0001>
module attributes {stable_mosaic.version = 11 : i64} {
  func.func @_fused_teacher_features_kernel(%arg0: memref<16x8xf32, #tpu.memory_space<vmem>>, %arg1: memref<16x1xi32, #tpu.memory_space<vmem>>, %arg2: memref<112x32xf32, #tpu.memory_space<vmem>>, %arg3: memref<16x80xf32, #tpu.memory_space<vmem>>) attributes {dimension_semantics = [], scalar_prefetch = 0 : i64, scratch_operands = 0 : i64, tpu.core_type = #tpu.core_type<tc>} {
    %0 = tpu.iota {dimensions = array<i32: 1>} : vector<16x16xi32>
    %c0 = arith.constant 0 : index
    %c0_0 = arith.constant 0 : index
    %1 = vector.load %arg1[%c0, %c0_0] : memref<16x1xi32, #tpu.memory_space<vmem>>, vector<16x1xi32>
    %2 = vector.broadcast %1 : vector<16x1xi32> to vector<16x16xi32>
    %3 = arith.cmpi eq, %2, %0 : vector<16x16xi32>
    %4 = arith.extui %3 : vector<16x16xi1> to vector<16x16xi32>
    %5 = arith.sitofp %4 : vector<16x16xi32> to vector<16x16xf32>
    %c0_1 = arith.constant 0 : index
    %c0_2 = arith.constant 0 : index
    %6 = vector.load %arg2[%c0_1, %c0_2] : memref<112x32xf32, #tpu.memory_space<vmem>>, vector<16x8xf32>
    %cst = arith.constant dense<0.000000e+00> : vector<16x8xf32>
    %7 = tpu.matmul %5, %6, %cst {dimension_numbers = #tpu.dot_dimension_numbers<[1], [0], [0], [1], [0, 0, 1, 1], [], []>} : vector<16x16xf32>, vector<16x8xf32>, vector<16x8xf32> -> vector<16x8xf32>
    %c0_3 = arith.constant 0 : index
    %c0_4 = arith.constant 0 : index
    %8 = vector.load %arg0[%c0_3, %c0_4] : memref<16x8xf32, #tpu.memory_space<vmem>>, vector<16x8xf32>
    %9 = arith.cmpf one, %8, %8 : vector<16x8xf32>
    %10 = arith.select %9, %7, %8 : vector<16x8xi1>, vector<16x8xf32>
    %c16 = arith.constant 16 : index
    %c0_5 = arith.constant 0 : index
    %11 = vector.load %arg2[%c16, %c0_5] : memref<112x32xf32, #tpu.memory_space<vmem>>, vector<8x32xf32>
    %cst_6 = arith.constant dense<0.000000e+00> : vector<16x32xf32>
    %12 = tpu.matmul %10, %11, %cst_6 {dimension_numbers = #tpu.dot_dimension_numbers<[1], [0], [0], [1], [0, 0, 1, 1], [], []>} : vector<16x8xf32>, vector<8x32xf32>, vector<16x32xf32> -> vector<16x32xf32>
    %c24 = arith.constant 24 : index
    %c0_7 = arith.constant 0 : index
    %13 = vector.load %arg2[%c24, %c0_7] : memref<112x32xf32, #tpu.memory_space<vmem>>, vector<1x32xf32>
    %14 = vector.broadcast %13 : vector<1x32xf32> to vector<16x32xf32>
    %15 = arith.addf %12, %14 : vector<16x32xf32>
    %c0_8 = arith.constant 0 : index
    %c0_9 = arith.constant 0 : index
    %16 = vector.load %arg3[%c0_8, %c0_9] : memref<16x80xf32, #tpu.memory_space<vmem>>, vector<16x32xf32>
    tpu.vector_store %arg3[%c0_8, %c0_9], %15 {strides = array<i32>} : memref<16x80xf32, #tpu.memory_space<vmem>>, vector<16x32xf32>,
    %cst_10 = arith.constant 0.00999999977 : f32
    %17 = vector.broadcast %cst_10 : f32 to vector<16x32xf32>
    %18 = arith.mulf %17, %15 : vector<16x32xf32>
    %19 = arith.maximumf %15, %18 : vector<16x32xf32>
    %c32 = arith.constant 32 : index
    %c0_11 = arith.constant 0 : index
    %20 = vector.load %arg2[%c32, %c0_11] : memref<112x32xf32, #tpu.memory_space<vmem>>, vector<32x32xf32>
    %cst_12 = arith.constant dense<0.000000e+00> : vector<16x32xf32>
    %21 = tpu.matmul %19, %20, %cst_12 {dimension_numbers = #tpu.dot_dimension_numbers<[1], [0], [0], [1], [0, 0, 1, 1], [], []>} : vector<16x32xf32>, vector<32x32xf32>, vector<16x32xf32> -> vector<16x32xf32>
    %c64 = arith.constant 64 : index
    %c0_13 = arith.constant 0 : index
    %22 = vector.load %arg2[%c64, %c0_13] : memref<112x32xf32, #tpu.memory_space<vmem>>, vector<1x32xf32>
    %23 = vector.broadcast %22 : vector<1x32xf32> to vector<16x32xf32>
    %24 = arith.addf %21, %23 : vector<16x32xf32>
    %c0_14 = arith.constant 0 : index
    %c32_15 = arith.constant 32 : index
    %25 = vector.load %arg3[%c0_14, %c32_15] : memref<16x80xf32, #tpu.memory_space<vmem>>, vector<16x32xf32>
    tpu.vector_store %arg3[%c0_14, %c32_15], %24 {strides = array<i32>} : memref<16x80xf32, #tpu.memory_space<vmem>>, vector<16x32xf32>,
    %cst_16 = arith.constant 0.00999999977 : f32
    %26 = vector.broadcast %cst_16 : f32 to vector<16x32xf32>
    %27 = arith.mulf %26, %24 : vector<16x32xf32>
    %28 = arith.maximumf %24, %27 : vector<16x32xf32>
    %c72 = arith.constant 72 : index
    %c0_17 = arith.constant 0 : index
    %29 = vector.load %arg2[%c72, %c0_17] : memref<112x32xf32, #tpu.memory_space<vmem>>, vector<32x8xf32>
    %cst_18 = arith.constant dense<0.000000e+00> : vector<16x8xf32>
    %30 = tpu.matmul %28, %29, %cst_18 {dimension_numbers = #tpu.dot_dimension_numbers<[1], [0], [0], [1], [0, 0, 1, 1], [], []>} : vector<16x32xf32>, vector<32x8xf32>, vector<16x8xf32> -> vector<16x8xf32>
    %c104 = arith.constant 104 : index
    %c0_19 = arith.constant 0 : index
    %31 = vector.load %arg2[%c104, %c0_19] : memref<112x32xf32, #tpu.memory_space<vmem>>, vector<1x8xf32>
    %32 = vector.broadcast %31 : vector<1x8xf32> to vector<16x8xf32>
    %33 = arith.addf %30, %32 : vector<16x8xf32>
    %c0_20 = arith.constant 0 : index
    %c64_21 = arith.constant 64 : index
    %34 = vector.load %arg3[%c0_20, %c64_21] : memref<16x80xf32, #tpu.memory_space<vmem>>, vector<16x8xf32>
    tpu.vector_store %arg3[%c0_20, %c64_21], %33 {strides = array<i32>} : memref<16x80xf32, #tpu.memory_space<vmem>>, vector<16x8xf32>,
    %cst_22 = arith.constant 0.00999999977 : f32
    %35 = vector.broadcast %cst_22 : f32 to vector<16x8xf32>
    %36 = arith.mulf %35, %33 : vector<16x8xf32>
    %37 = arith.maximumf %33, %36 : vector<16x8xf32>
    %c0_23 = arith.constant 0 : index
    %c72_24 = arith.constant 72 : index
    %38 = vector.load %arg3[%c0_23, %c72_24] : memref<16x80xf32, #tpu.memory_space<vmem>>, vector<16x8xf32>
    tpu.vector_store %arg3[%c0_23, %c72_24], %37 {strides = array<i32>} : memref<16x80xf32, #tpu.memory_space<vmem>>, vector<16x8xf32>,
    return
  }
}

</mosaic_0001>

<bundles_post_ra>
// kernel: tpu_custom_call.1
= control target key start
LH: loop header
LB: loop body
LE: loop exit
PB: predicated region body
PF: predicated region fallthrough
CT: control target
= control target key end

     0   :  { %v286_v2 = vmov 0   ;;  %s377_s0 = inlined_call_operand.vmem [shape: f32[16,8], index: 0, kind: input, shape index: {}]   ;;  %s378_s1 = inlined_call_operand.vmem [shape: s32[16,1], index: 1, kind: input, shape index: {}]   ;;  %s379_s2 = inlined_call_operand.vmem [shape: f32[112,32], index: 2, kind: input, shape index: {}]   ;;  %s380_s3 = inlined_call_operand.hbm [shape: f32[16,80], index: 3, kind: output, shape index: {}]  }
   0x1   :  { %v17_v0 = vld [vmem:[%s378_s1] sm:$0xff]  ;;  %v32_v1 = vld [vmem:[%s379_s2 + $0x8] sm:$0xff]  ;;  %256 = vset.pattern.permute.xlu0 %v286_v2 }
   0x2   :  { %54 = vmatpush.msra.mxu0 %v32_v1  ;;  %20 = vperm.xlu0 %256, %v17_v0  }
   0x3   :  { %8 = vsyncpa [#allocation3], 0  ;;  %v18_v3 = vld [vmem:[%s378_s1 + $0x8] sm:$0xff]  ;;  %v31_v4 = vld [vmem:[%s379_s2] sm:$0xff]  ;;  %v15_v5 = vlaneseq  ;;  %vm33_vm0 = vcmask 130048   ;;  %v287_v8 = vmov 0.0  }
   0x4   :  { %55 = vmatpush.msra.mxu0 %v31_v4  ;;  %v69_v12 = vld [vmem:[%s379_s2 + $0x10] sm:$0xff]  ;;  %v63_v13 = vld [vmem:[%s377_s0] sm:$0xff]  ;;  %vm72_vm4 = vcmask 64512   ;;  %v64_v16 = vld [vmem:[%s377_s0 + $0x8] sm:$0xff]  ;;  %vm102_vm6 = vcmask 261120   ;;  %s288_s17 = smov 32  }
   0x5   :  { %v16_v6 = vand.u32 127, %v15_v5  ;;  %94 = vmatpush.msra.mxu1 %v69_v12  ;;  %vm65_vm3 = vcmp.ne.f32.partialorder %v63_v13, %v63_v13  ;;  %vm66_vm5 = vcmp.ne.f32.partialorder %v64_v16, %v64_v16  ;;  %v112_v19 = vld [vmem:[%s379_s2 + $0x38] sm:$0xff]  ;;  %v111_v20 = vld [vmem:[%s379_s2 + $0x30] sm:$0xff]  ;;  %v110_v21 = vld [vmem:[%s379_s2 + $0x28] sm:$0xff]  ;;  %vm152_vm7 = vcmask 523520   ;;  %s289_s20 = smov 64  }
   0x6   :  { %133 = vmatpush.msra.mxu2 %v112_v19  ;;  %v109_v22 = vld [vmem:[%s379_s2 + $0x20] sm:$0xff]  ;;  %v257_v23 = vld [vmem:[%s379_s2 + $0x18] ss:$0 sm:$0xff]  ;;  %v160_v34 = vld [vmem:[%s379_s2 + $0x50] sm:$0xff]  ;;  %s290_s1 = smov 72   ;;  %vm202_vm8 = vcmask 589312  }
   0x7   :  { %v162_v32 = vld [vmem:[%s379_s2 + $0x60] sm:$0xff]  ;;  %v161_v33 = vld [vmem:[%s379_s2 + $0x58] sm:$0xff]  ;;  %v159_v35 = vld [vmem:[%s379_s2 + $0x48] sm:$0xff]  ;;  %vm217_vm9 = vcmask 654912   ;;  %s226_s24 = sshll.u32 %s380_s3, 4  ;;  %s292_s25 = smov 128   ;;  %s227_s24 = int_to_ptr.hbm [resolvable:$true] %s226_s24 }
   0x8   :  { %134 = vmatpush.msra.mxu2 %v111_v20  ;;  %183 = vmatpush.msra.mxu3 %v162_v32  ;;  %v258_v36 = vld [vmem:[%s379_s2 + $0x40] ss:$0 sm:$0xff]  ;;  %v259_v47 = vld [vmem:[%s379_s2 + $0x68] ss:$0 sm:$0xff]  ;;  %s291_s2 = smov [#allocation2]   ;;  %s293_s26 = smov 8  }
   0x9   :  { %s224_s21 = sshll.u32 %s291_s2, 4  ;;  %s225_s21 = int_to_ptr.vmem [resolvable:$true] %s224_s21 }
   0xa   :  { %23 = vperm.xlu0 %256, %v18_v3   ;;  %135 = vmatpush.msra.mxu2 %v110_v21 }
   0xb   :  { %184 = vmatpush.msra.mxu3 %v161_v33 }
   0xc   :  { %136 = vmatpush.msra.mxu2 %v109_v22 }
   0xd   :  { %185 = vmatpush.msra.mxu3 %v160_v34 }
   0xf   :  { %186 = vmatpush.msra.mxu3 %v159_v35 }
  0x74   :  { %v21_v7 = vpop.permute.xlu0 %20 }
  0x75   :  { %vm25_vm1 = vcmp.eq.s32.totalorder %v21_v7, %v16_v6 }
  0x76   :  { %v238_v9 = vsel %vm25_vm1, 1.0, %v287_v8 }
  0x77   :  { %240 = vmatmul.msk.f32.vlgmr.msra.gmra.mxu0 %vm33_vm0, %v238_v9 }
  0x7c   :  { %v24_v10 = vpop.permute.xlu0 %23 }
  0x7d   :  { %vm26_vm2 = vcmp.eq.s32.totalorder %v24_v10, %v16_v6 }
  0x7e   :  { %v239_v11 = vsel %vm26_vm2, 1.0, %v287_v8 }
  0x7f   :  { %241 = vmatmul.msk.f32.gmra.mxu0 %vm33_vm0, %v239_v11 }
  0xf4   :  { %v57_v14 = vpop.f32.mrf.mxu0 }
  0xf5   :  { %v67_v15 = vsel %vm65_vm3, %v57_v14, %v63_v13 }
  0xf6   :  { %242 = vmatmul.msk.f32.vlgmr.msra.gmra.mxu1 %vm72_vm4, %v67_v15 }
  0xfc   :  { %v60_v17 = vpop.f32.mrf.mxu0 }
  0xfd   :  { %v68_v18 = vsel %vm66_vm5, %v60_v17, %v64_v16 }
  0xfe   :  { %243 = vmatmul.msk.f32.gmra.mxu1 %vm72_vm4, %v68_v18 }
 0x173   :  { %v96_v24 = vpop.f32.mrf.mxu1 }
 0x174   :  { %v97_v25 = vadd.f32 %v257_v23, %v96_v24 }
 0x176   :  { %v105_v26 = vmul.f32 0.01, %v97_v25  ;;  %103 = vst.msk [vmem:[#allocation2] sm:$0xff] %vm102_vm6, %v97_v25 }
 0x178   :  { %v107_v27 = vmax.f32 %v97_v25, %v105_v26 }
 0x17a   :  { %244 = vmatmul.msk.f32.vlgmr.msra.gmra.mxu2 %vm102_vm6, %v107_v27 }
 0x17b   :  { %v99_v28 = vpop.f32.mrf.mxu1 }
 0x17c   :  { %v100_v29 = vadd.f32 %v257_v23, %v99_v28 }
 0x17e   :  { %v106_v30 = vmul.f32 0.01, %v100_v29  ;;  %104 = vst.msk [vmem:[#allocation2 + $0x8] sm:$0xff] %vm102_vm6, %v100_v29 }
 0x180   :  { %v108_v31 = vmax.f32 %v100_v29, %v106_v30 }
 0x182   :  { %245 = vmatmul.msk.f32.gmra.mxu2 %vm102_vm6, %v108_v31 }
 0x1fd   :  { %v138_v37 = vpop.f32.mrf.mxu2 }
 0x1fe   :  { %v139_v38 = vadd.f32 %v258_v36, %v138_v37 }
 0x200   :  { %v155_v39 = vmul.f32 0.01, %v139_v38  ;;  %146 = vrot.lane.b32.xlu1 %v139_v38, %s288_s17 }
 0x202   :  { %v157_v40 = vmax.f32 %v139_v38, %v155_v39 }
 0x204   :  { %246 = vmatmul.msk.f32.vlgmr.msra.gmra.mxu3 %vm102_vm6, %v157_v40 }
 0x205   :  { %v141_v41 = vpop.f32.mrf.mxu2 }
 0x206   :  { %v142_v42 = vadd.f32 %v258_v36, %v141_v41 }
 0x208   :  { %v156_v43 = vmul.f32 0.01, %v142_v42  ;;  %148 = vrot.lane.b32.xlu1 %v142_v42, %s288_s17 }
 0x20a   :  { %v158_v44 = vmax.f32 %v142_v42, %v156_v43 }
 0x20c   :  { %247 = vmatmul.msk.f32.gmra.mxu3 %vm102_vm6, %v158_v44 }
 0x272   :  { %v147_v45 = vpop.permute.xlu1 %146 }
 0x273   :  { %153 = vst.msk [vmem:[#allocation2] sm:$0xff] %vm152_vm7, %v147_v45 }
 0x27a   :  { %v149_v46 = vpop.permute.xlu1 %148 }
 0x27b   :  { %154 = vst.msk [vmem:[#allocation2 + $0x8] sm:$0xff] %vm152_vm7, %v149_v46 }
 0x287   :  { %v188_v48 = vpop.f32.mrf.mxu3 }
 0x288   :  { %v189_v49 = vadd.f32 %v259_v47, %v188_v48 }
 0x28a   :  { %v205_v50 = vmul.f32 0.01, %v189_v49  ;;  %196 = vrot.lane.b32.xlu2 %v189_v49, %s289_s20 }
 0x28c   :  { %v207_v51 = vmax.f32 %v189_v49, %v205_v50 }
 0x28e   :  { %211 = vrot.lane.b32.xlu0 %v207_v51, %s290_s1 }
 0x28f   :  { %v191_v52 = vpop.f32.mrf.mxu3 }
 0x290   :  { %v192_v53 = vadd.f32 %v259_v47, %v191_v52 }
 0x292   :  { %v206_v54 = vmul.f32 0.01, %v192_v53  ;;  %198 = vrot.lane.b32.xlu2 %v192_v53, %s289_s20 }
 0x294   :  { %v208_v55 = vmax.f32 %v192_v53, %v206_v54 }
 0x296   :  { %213 = vrot.lane.b32.xlu1 %v208_v55, %s290_s1 }
 0x2e4   :  { %v197_v56 = vpop.permute.xlu2 %196 }
 0x2e5   :  { %203 = vst.msk [vmem:[#allocation2] sm:$0xff] %vm202_vm8, %v197_v56 }
 0x2ec   :  { %v199_v57 = vpop.permute.xlu2 %198 }
 0x2ed   :  { %204 = vst.msk [vmem:[#allocation2 + $0x8] sm:$0xff] %vm202_vm8, %v199_v57 }
 0x300   :  { %v212_v58 = vpop.permute.xlu0 %211 }
 0x301   :  { %218 = vst.msk [vmem:[#allocation2] sm:$0xff] %vm217_vm9, %v212_v58 }
 0x308   :  { %v214_v59 = vpop.permute.xlu1 %213 }
 0x309   :  { %219 = vst.msk [vmem:[#allocation2 + $0x8] sm:$0xff] %vm217_vm9, %v214_v59 }
 0x30a   :  { %232 = dma.vmem_to_hbm [thread:$0]  %s225_s21, 256, %s227_s24, [#allocation3], %s292_s25, %s292_s25, %s293_s26  }
 0x30b   :  { %284 = dma.done.wait [#allocation3], 256  }
 0x30c   :  { %285 = vsyncadd [#allocation3], 4294967040 }
 0x30d   :  { %237 = vsyncpa [#allocation3], 1 }

</bundles_post_ra>
